<compile_context>
chip_gen: v6e
topology: v6e:2x2x1
jax: 0.10.0
libtpu: 0.0.40
codegen_flags: <defaults>
</compile_context>

<pallas_src>
import jax
import jax.numpy as jnp
from jax import lax
from jax.experimental import pallas as pl
from jax.experimental.pallas import tpu as pltpu

_EPS = 1e-20   # guards on ||.||^2 / <g,g>; NOT in the PyTorch reference (which
               # would produce inf/nan for zero norms) -- benign, documented.
_W_L2 = 0.5    # weights[0] for the 'l2' term of optim_seq


# ---------------------------------------------------------------------------
# Kernels
# ---------------------------------------------------------------------------
def _bp2si_heavy_kernel(new_ref, ori_ref, g_ref, st_ref, out_ref):
    """Misclassified branch: full boundary projection on one batch tile.

    new_ref : VMEM f32[TB,3N] -- new_points (spin frame), coordinate-major
    ori_ref : VMEM f32[TB,3N] -- ori_points (world frame), coordinate-major
    g_ref   : VMEM f32[TB,3N] -- g_hat (spin frame), coordinate-major
    st_ref  : VMEM f32[TB,16] -- [S row-major (9), t (3), adv_step, grad_step, 0, 0]
    out_ref : VMEM f32[TB,3N] -- output points (world frame), coordinate-major
    """
    n = new_ref.shape[1] // 3
    st = st_ref[...]                                   # (TB, 16)

    def s_el(j, i):                                    # S[:, j, i] as (TB, 1)
        k = 3 * j + i
        return st[:, k:k + 1]

    def col(k):                                        # generic (TB, 1) column
        return st[:, k:k + 1]

    def planes(ref):                                   # three contiguous lane slices
        return [ref[:, j * n:(j + 1) * n] for j in range(3)]

    def row_sumsq(ps):                                 # per-batch-row sum of squares
        acc = jnp.sum(ps[0] * ps[0], axis=-1, keepdims=True)
        for p in ps[1:]:
            acc = acc + jnp.sum(p * p, axis=-1, keepdims=True)
        return acc                                     # (TB, 1)

    new_p = planes(new_ref)
    ori_p = planes(ori_ref)
    g_p = planes(g_ref)

    # get_original_point_cloud: pw = S^T new - t  (world frame)
    pw = [s_el(0, i) * new_p[0] + s_el(1, i) * new_p[1] + s_el(2, i) * new_p[2]
          - col(9 + i) for i in range(3)]

    # analytic grad of L = sum_b ||pw_b - ori_b||_F w.r.t. pw, chained back to
    # the spin frame: grad_new[j] = sum_i S[j,i] * grad_pw[i]
    diff = [pw[i] - ori_p[i] for i in range(3)]
    inv_l = lax.rsqrt(jnp.maximum(row_sumsq(diff), _EPS))
    gpw = [d * inv_l for d in diff]
    gnew = [s_el(j, 0) * gpw[0] + s_el(j, 1) * gpw[1] + s_el(j, 2) * gpw[2]
            for j in range(3)]

    # loss_cal: per-batch normalize, weight, zero the z component
    inv_d = lax.rsqrt(jnp.maximum(row_sumsq(gnew), _EPS)) * _W_L2
    d0 = gnew[0] * inv_d
    d1 = gnew[1] * inv_d                               # deltas = [d0, d1, 0]

    # proj_surface(deltas, g_hat): beta = <deltas,g> / <g,g>  (exact division)
    num = (jnp.sum(d0 * g_p[0], axis=-1, keepdims=True)
           + jnp.sum(d1 * g_p[1], axis=-1, keepdims=True))
    beta = num / jnp.maximum(row_sumsq(g_p), _EPS)
    alpha = [d0 - beta * g_p[0], d1 - beta * g_p[1], -beta * g_p[2]]

    # alpha_hat = alpha / ||alpha||, folded with the adversarial step size
    step = lax.rsqrt(jnp.maximum(row_sumsq(alpha), _EPS)) * col(12)

    # out = to_world(new - alpha_hat*lr) = pw - step * (S^T alpha)  (reuses pw,
    # saves the full to_world recomputation and ends new_p's live range early)
    for i in range(3):
        out_ref[:, i * n:(i + 1) * n] = pw[i] - step * (
            s_el(0, i) * alpha[0] + s_el(1, i) * alpha[1] + s_el(2, i) * alpha[2])


def _bp2si_light_kernel(new_ref, g_ref, st_ref, out_ref):
    """Still-correct branch: z = new - g_hat*grad_lr, then world transform.

    ori_points is NOT an operand -> no HBM stream for it in this branch.
    """
    n = new_ref.shape[1] // 3
    st = st_ref[...]

    def s_el(j, i):
        k = 3 * j + i
        return st[:, k:k + 1]

    def col(k):
        return st[:, k:k + 1]

    step = col(13)                                     # grad step size
    z = [new_ref[:, j * n:(j + 1) * n] - g_ref[:, j * n:(j + 1) * n] * step
         for j in range(3)]
    for i in range(3):
        out_ref[:, i * n:(i + 1) * n] = (s_el(0, i) * z[0] + s_el(1, i) * z[1]
                                         + s_el(2, i) * z[2] - col(9 + i))


# ---------------------------------------------------------------------------
# Tiling / pallas_call wrappers
# ---------------------------------------------------------------------------
def _vmem_capacity_bytes():
    try:
        cap = getattr(pltpu.get_tpu_info(), "vmem_capacity_bytes", None)
        if cap:
            return int(cap)
    except Exception:
        pass
    return 64 * 1024 * 1024          # conservative fallback (v7x per-TC VMEM)


def _round8(x):
    return max(8, (x // 8) * 8)


def _pick_batch_tile(b, f):
    """Generation-aware batch-tile size + scoped-VMEM limit.

    Counts the double-buffered I/O blocks *and* the in-body temporaries of the
    heavy branch, keeps headroom for compiler scratch, and guarantees a grid
    of at least 2 (4 for larger batches) for megacore sharding / pipelining.
    """
    cap = _vmem_capacity_bytes()
    vmem_limit = cap * 3 // 4                          # 48 MiB v7x, 96 MiB v5e/v6e
    budget = max(vmem_limit - 16 * 1024 * 1024, 8 * 1024 * 1024)
    # per batch row: 4 F-wide streams (new, ori, g, out) double-buffered (8F)
    # plus ~6 live F-wide temporaries (pw, diff/gpw, gnew, alpha, ...)
    bytes_per_row = 14 * f * 4
    tb = 8
    for cand in (512, 256, 128, 64, 32, 16, 8):
        if cand * bytes_per_row <= budget:
            tb = cand
            break
    # never pick a tile (much) larger than the padded batch
    tb = min(tb, _round8(b + 7))
    # guarantee grid >= 2 (>= 4 for larger B): dual-TC sharding + DMA overlap
    if b >= 16:
        while tb > 8 and (b + tb - 1) // tb < 2:
            tb = _round8(tb // 2)
    if b >= 64:
        while tb > 16 and (b + tb - 1) // tb < 4:
            tb = _round8(tb // 2)
    return tb, vmem_limit


def _pad_rows(x, b_pad):
    b = x.shape[0]
    return x if b == b_pad else jnp.pad(x, ((0, b_pad - b), (0, 0)))


def _specs(tb, f):
    row = pl.BlockSpec((tb, f), lambda i: (i, 0))
    st = pl.BlockSpec((tb, 16), lambda i: (i, 0))
    return row, st


def _heavy_call(new_f, ori_f, g_f, st_f, tb, vmem_limit):
    b, f = new_f.shape
    b_pad = pl.cdiv(b, tb) * tb
    row, st_spec = _specs(tb, f)
    out = pl.pallas_call(
        _bp2si_heavy_kernel,
        out_shape=jax.ShapeDtypeStruct((b_pad, f), jnp.float32),
        grid=(b_pad // tb,),
        in_specs=[row, row, row, st_spec],
        out_specs=row,
        compiler_params=pltpu.CompilerParams(
            dimension_semantics=("parallel",),
            vmem_limit_bytes=vmem_limit),
    )(_pad_rows(new_f, b_pad), _pad_rows(ori_f, b_pad),
      _pad_rows(g_f, b_pad), _pad_rows(st_f, b_pad))
    return out if b_pad == b else out[:b]


def _light_call(new_f, g_f, st_f, tb, vmem_limit):
    b, f = new_f.shape
    b_pad = pl.cdiv(b, tb) * tb
    row, st_spec = _specs(tb, f)
    out = pl.pallas_call(
        _bp2si_light_kernel,
        out_shape=jax.ShapeDtypeStruct((b_pad, f), jnp.float32),
        grid=(b_pad // tb,),
        in_specs=[row, row, st_spec],
        out_specs=row,
        compiler_params=pltpu.CompilerParams(
            dimension_semantics=("parallel",),
            vmem_limit_bytes=vmem_limit),
    )(_pad_rows(new_f, b_pad), _pad_rows(g_f, b_pad), _pad_rows(st_f, b_pad))
    return out if b_pad == b else out[:b]


@jax.jit
def _bp2si_update(new_f, ori_f, g_f, spin9, trans3, steps, flag):
    """flag selects the heavy (boundary projection) or light (grad step) kernel;
    the light branch never touches ori_f in HBM."""
    b, f = new_f.shape
    st_f = jnp.concatenate(
        [spin9.astype(jnp.float32), trans3.astype(jnp.float32),
         jnp.broadcast_to(steps.astype(jnp.float32)[None, :], (b, 2)),
         jnp.zeros((b, 2), jnp.float32)], axis=1)       # (B, 16)
    tb, vmem_limit = _pick_batch_tile(b, f)
    ops = (new_f.astype(jnp.float32), ori_f.astype(jnp.float32),
           g_f.astype(jnp.float32), st_f)
    return lax.cond(
        flag,
        lambda o: _heavy_call(o[0], o[1], o[2], o[3], tb, vmem_limit),
        lambda o: _light_call(o[0], o[2], o[3], tb, vmem_limit),
        ops)


# ---------------------------------------------------------------------------
# Module wrapper
# ---------------------------------------------------------------------------
class BoundaryProjection2SI:
    """JAX/Pallas port of boundary_projection_2_si (forward pass)."""

    def __init__(self, step_size=0.01, stage2_steps=0.01, exponential_step=True,
                 weights=(0.5, 0.5), optim_seq=('l2', 'curv')):
        # deterministic parameters from boundary_projection_2.__init__/init()
        self.gamma = 0.09
        self.initial_lr = 0.03
        self.learning_rate = self.initial_lr
        self.grad_lr = self.initial_lr
        self.weights = list(weights)
        self.optim_seq = list(optim_seq)
        self.step_size = step_size
        self.stage2_step_size = stage2_steps
        self.exponential_step = exponential_step
        self.epoch = 0
        self.in_out = False
        self.stage = 1
        # TODO(synk): output_losses / output_points best-iterate bookkeeping and the
        # self.stage reset need the undefined curvature loss and a host sync; omitted.

    # ---- hot-loop path: everything stays coordinate-major [B, 3N] -----------
    def forward_cm(self, new_f, spin9, trans3, ori_f, g_f, logits, target):
        # logits.argmax(1).item() != target.item() -- the reference is batch-size-1;
        # the single flag is broadcast to every batch row (same caveat as the ref).
        flag = jnp.argmax(logits[0]) != target[0]
        adv_step = self.learning_rate if self.exponential_step else self.stage2_step_size
        grad_step = self.grad_lr if self.exponential_step else self.step_size
        steps = jnp.asarray([adv_step, grad_step], dtype=jnp.float32)
        out_f = _bp2si_update(new_f, ori_f, g_f, spin9, trans3, steps, flag)
        # lazy device bool; bool(self.in_out) would force a host sync
        self.in_out = flag
        # update_step_size() -- host-side scalar schedule
        self.learning_rate *= (1.0 - self.gamma)
        self.grad_lr *= (1.0 - self.gamma)
        return out_f

    # ---- convenience wrapper matching the PyTorch [B, N, 3] API -------------
    def forward(self, new_points, spin_axis_matrix, translation_matrix,
                ori_points, normal_vec, g_hat, logits, target):
        # TODO(synk): local_curvature_loss / hausdorff / chamfer (and loss_wrapper)
        # are not defined in the reference module; only the reproducible 'l2'
        # stage-1 term is implemented, so normal_vec is unused.
        del normal_vec
        b, n, _ = new_points.shape
        f = 3 * n

        def cm(x):   # coordinate-major flatten: [B,N,3] -> [B,3,N] -> [B,3N]
            return jnp.transpose(x, (0, 2, 1)).reshape(b, f).astype(jnp.float32)

        # NOTE: in an attack loop, keep the clouds stored coord-major and call
        # forward_cm() directly -- these transposes then vanish from the hot path.
        out_f = self.forward_cm(
            cm(new_points),
            spin_axis_matrix.reshape(b, 9).astype(jnp.float32),
            translation_matrix.reshape(b, 3).astype(jnp.float32),
            cm(ori_points), cm(g_hat), logits, target)
        return jnp.transpose(out_f.reshape(b, 3, n), (0, 2, 1))


# ---------------------------------------------------------------------------
# Pure-JAX reference (mirror of the kernel math) for correctness checking
# ---------------------------------------------------------------------------
def _jax_reference(new_points, spin, trans, ori_points, g_hat, in_out,
                   adv_step, grad_step):
    def to_world(x):
        return jnp.einsum('bji,bnj->bni', spin, x) - trans[:, None, :]
    pw = to_world(new_points)
    diff = pw - ori_points
    inv_l = lax.rsqrt(jnp.maximum(jnp.sum(diff * diff, axis=(1, 2), keepdims=True), _EPS))
    gpw = diff * inv_l
    gnew = jnp.einsum('bji,bni->bnj', spin, gpw)
    inv_d = lax.rsqrt(jnp.maximum(jnp.sum(gnew * gnew, axis=(1, 2), keepdims=True), _EPS))
    deltas = (_W_L2 * inv_d) * gnew
    deltas = deltas.at[:, :, 2].set(0.0)
    num = jnp.sum(deltas * g_hat, axis=(1, 2), keepdims=True)
    den = jnp.maximum(jnp.sum(g_hat * g_hat, axis=(1, 2), keepdims=True), _EPS)
    beta = num / den
    alpha = deltas - beta * g_hat
    alpha_hat = alpha * lax.rsqrt(
        jnp.maximum(jnp.sum(alpha * alpha, axis=(1, 2), keepdims=True), _EPS))
    z = jnp.where(in_out, new_points - alpha_hat * adv_step,
                  new_points - g_hat * grad_step)
    return to_world(z)


if __name__ == "__main__":
    key = jax.random.PRNGKey(0)
    ks = jax.random.split(key, 7)

    B, N, C = 2, 128, 10            # 3*N = 384 (lane-dense, multiple of 128)
    new_points = jax.random.normal(ks[0], (B, N, 3), dtype=jnp.float32)
    ori_points = jax.random.normal(ks[1], (B, N, 3), dtype=jnp.float32)
    normal_vec = jax.random.normal(ks[2], (B, N, 3), dtype=jnp.float32)
    g_hat = jax.random.normal(ks[3], (B, N, 3), dtype=jnp.float32)
    g_hat = g_hat / jnp.linalg.norm(g_hat.reshape(B, -1), axis=1)[:, None, None]
    spin = jax.random.normal(ks[4], (B, 3, 3), dtype=jnp.float32) * 0.1 + jnp.eye(3)[None]
    trans = jax.random.normal(ks[5], (B, 3), dtype=jnp.float32)
    logits = jax.random.normal(ks[6], (B, C), dtype=jnp.float32)

    pred = int(jnp.argmax(logits[0]))
    # exercise both branches (misclassified -> heavy kernel, correct -> light kernel)
    for tgt_val, want_in_out in (((pred + 1) % C, True), (pred, False)):
        target = jnp.full((B,), tgt_val, dtype=jnp.int32)
        bp = BoundaryProjection2SI(step_size=0.01, stage2_steps=0.01,
                                   exponential_step=True)
        adv_step, grad_step = bp.learning_rate, bp.grad_lr
        out = bp.forward(new_points, spin, trans, ori_points, normal_vec,
                         g_hat, logits, target)
        out = jax.block_until_ready(out)
        assert out.shape == (B, N, 3)
        ref = _jax_reference(new_points, spin, trans, ori_points, g_hat,
                             jnp.asarray(want_in_out), adv_step, grad_step)
        err = float(jnp.max(jnp.abs(out - ref)))
        assert jnp.allclose(out, ref, atol=2e-3, rtol=2e-3), err

    print("KERNEL_OK")
</pallas_src>

<mosaic_0001>
module attributes {stable_mosaic.version = 11 : i64} {
  func.func @_bp2si_light_kernel(%arg0: i32, %arg1: memref<8x384xf32, #tpu.memory_space<vmem>>, %arg2: memref<8x384xf32, #tpu.memory_space<vmem>>, %arg3: memref<8x16xf32, #tpu.memory_space<vmem>>, %arg4: memref<8x384xf32, #tpu.memory_space<vmem>>) attributes {dimension_semantics = [#tpu.dimension_semantics<parallel>], iteration_bounds = array<i64: 1>, scalar_prefetch = 0 : i64, scratch_operands = 0 : i64, tpu.core_type = #tpu.core_type<tc>, window_params = [{transform_indices = @transform_0, window_bounds = array<i64: 8, 384>}, {transform_indices = @transform_1, window_bounds = array<i64: 8, 384>}, {transform_indices = @transform_2, window_bounds = array<i64: 8, 16>}, {transform_indices = @transform_3, window_bounds = array<i64: 8, 384>}]} {
    %c0 = arith.constant 0 : index
    %c0_0 = arith.constant 0 : index
    %0 = vector.load %arg3[%c0, %c0_0] : memref<8x16xf32, #tpu.memory_space<vmem>>, vector<8x16xf32>
    %1 = vector.extract_strided_slice %0 {offsets = [0, 13], sizes = [8, 1], strides = [1, 1]} : vector<8x16xf32> to vector<8x1xf32>
    %c0_1 = arith.constant 0 : index
    %c0_2 = arith.constant 0 : index
    %2 = vector.load %arg1[%c0_1, %c0_2] : memref<8x384xf32, #tpu.memory_space<vmem>>, vector<8x128xf32>
    %c0_3 = arith.constant 0 : index
    %c0_4 = arith.constant 0 : index
    %3 = vector.load %arg2[%c0_3, %c0_4] : memref<8x384xf32, #tpu.memory_space<vmem>>, vector<8x128xf32>
    %4 = vector.broadcast %1 : vector<8x1xf32> to vector<8x128xf32>
    %5 = arith.mulf %3, %4 : vector<8x128xf32>
    %6 = arith.subf %2, %5 : vector<8x128xf32>
    %c0_5 = arith.constant 0 : index
    %c128 = arith.constant 128 : index
    %7 = vector.load %arg1[%c0_5, %c128] : memref<8x384xf32, #tpu.memory_space<vmem>>, vector<8x128xf32>
    %c0_6 = arith.constant 0 : index
    %c128_7 = arith.constant 128 : index
    %8 = vector.load %arg2[%c0_6, %c128_7] : memref<8x384xf32, #tpu.memory_space<vmem>>, vector<8x128xf32>
    %9 = vector.broadcast %1 : vector<8x1xf32> to vector<8x128xf32>
    %10 = arith.mulf %8, %9 : vector<8x128xf32>
    %11 = arith.subf %7, %10 : vector<8x128xf32>
    %c0_8 = arith.constant 0 : index
    %c256 = arith.constant 256 : index
    %12 = vector.load %arg1[%c0_8, %c256] : memref<8x384xf32, #tpu.memory_space<vmem>>, vector<8x128xf32>
    %c0_9 = arith.constant 0 : index
    %c256_10 = arith.constant 256 : index
    %13 = vector.load %arg2[%c0_9, %c256_10] : memref<8x384xf32, #tpu.memory_space<vmem>>, vector<8x128xf32>
    %14 = vector.broadcast %1 : vector<8x1xf32> to vector<8x128xf32>
    %15 = arith.mulf %13, %14 : vector<8x128xf32>
    %16 = arith.subf %12, %15 : vector<8x128xf32>
    %17 = vector.extract_strided_slice %0 {offsets = [0, 0], sizes = [8, 1], strides = [1, 1]} : vector<8x16xf32> to vector<8x1xf32>
    %18 = vector.broadcast %17 : vector<8x1xf32> to vector<8x128xf32>
    %19 = arith.mulf %18, %6 : vector<8x128xf32>
    %20 = vector.extract_strided_slice %0 {offsets = [0, 3], sizes = [8, 1], strides = [1, 1]} : vector<8x16xf32> to vector<8x1xf32>
    %21 = vector.broadcast %20 : vector<8x1xf32> to vector<8x128xf32>
    %22 = arith.mulf %21, %11 : vector<8x128xf32>
    %23 = arith.addf %19, %22 : vector<8x128xf32>
    %24 = vector.extract_strided_slice %0 {offsets = [0, 6], sizes = [8, 1], strides = [1, 1]} : vector<8x16xf32> to vector<8x1xf32>
    %25 = vector.broadcast %24 : vector<8x1xf32> to vector<8x128xf32>
    %26 = arith.mulf %25, %16 : vector<8x128xf32>
    %27 = arith.addf %23, %26 : vector<8x128xf32>
    %28 = vector.extract_strided_slice %0 {offsets = [0, 9], sizes = [8, 1], strides = [1, 1]} : vector<8x16xf32> to vector<8x1xf32>
    %29 = vector.broadcast %28 : vector<8x1xf32> to vector<8x128xf32>
    %30 = arith.subf %27, %29 : vector<8x128xf32>
    %c0_11 = arith.constant 0 : index
    %c0_12 = arith.constant 0 : index
    %31 = vector.load %arg4[%c0_11, %c0_12] : memref<8x384xf32, #tpu.memory_space<vmem>>, vector<8x128xf32>
    tpu.vector_store %arg4[%c0_11, %c0_12], %30 {strides = array<i32>} : memref<8x384xf32, #tpu.memory_space<vmem>>, vector<8x128xf32>,
    %32 = vector.extract_strided_slice %0 {offsets = [0, 1], sizes = [8, 1], strides = [1, 1]} : vector<8x16xf32> to vector<8x1xf32>
    %33 = vector.broadcast %32 : vector<8x1xf32> to vector<8x128xf32>
    %34 = arith.mulf %33, %6 : vector<8x128xf32>
    %35 = vector.extract_strided_slice %0 {offsets = [0, 4], sizes = [8, 1], strides = [1, 1]} : vector<8x16xf32> to vector<8x1xf32>
    %36 = vector.broadcast %35 : vector<8x1xf32> to vector<8x128xf32>
    %37 = arith.mulf %36, %11 : vector<8x128xf32>
    %38 = arith.addf %34, %37 : vector<8x128xf32>
    %39 = vector.extract_strided_slice %0 {offsets = [0, 7], sizes = [8, 1], strides = [1, 1]} : vector<8x16xf32> to vector<8x1xf32>
    %40 = vector.broadcast %39 : vector<8x1xf32> to vector<8x128xf32>
    %41 = arith.mulf %40, %16 : vector<8x128xf32>
    %42 = arith.addf %38, %41 : vector<8x128xf32>
    %43 = vector.extract_strided_slice %0 {offsets = [0, 10], sizes = [8, 1], strides = [1, 1]} : vector<8x16xf32> to vector<8x1xf32>
    %44 = vector.broadcast %43 : vector<8x1xf32> to vector<8x128xf32>
    %45 = arith.subf %42, %44 : vector<8x128xf32>
    %c0_13 = arith.constant 0 : index
    %c128_14 = arith.constant 128 : index
    %46 = vector.load %arg4[%c0_13, %c128_14] : memref<8x384xf32, #tpu.memory_space<vmem>>, vector<8x128xf32>
    tpu.vector_store %arg4[%c0_13, %c128_14], %45 {strides = array<i32>} : memref<8x384xf32, #tpu.memory_space<vmem>>, vector<8x128xf32>,
    %47 = vector.extract_strided_slice %0 {offsets = [0, 2], sizes = [8, 1], strides = [1, 1]} : vector<8x16xf32> to vector<8x1xf32>
    %48 = vector.broadcast %47 : vector<8x1xf32> to vector<8x128xf32>
    %49 = arith.mulf %48, %6 : vector<8x128xf32>
    %50 = vector.extract_strided_slice %0 {offsets = [0, 5], sizes = [8, 1], strides = [1, 1]} : vector<8x16xf32> to vector<8x1xf32>
    %51 = vector.broadcast %50 : vector<8x1xf32> to vector<8x128xf32>
    %52 = arith.mulf %51, %11 : vector<8x128xf32>
    %53 = arith.addf %49, %52 : vector<8x128xf32>
    %54 = vector.extract_strided_slice %0 {offsets = [0, 8], sizes = [8, 1], strides = [1, 1]} : vector<8x16xf32> to vector<8x1xf32>
    %55 = vector.broadcast %54 : vector<8x1xf32> to vector<8x128xf32>
    %56 = arith.mulf %55, %16 : vector<8x128xf32>
    %57 = arith.addf %53, %56 : vector<8x128xf32>
    %58 = vector.extract_strided_slice %0 {offsets = [0, 11], sizes = [8, 1], strides = [1, 1]} : vector<8x16xf32> to vector<8x1xf32>
    %59 = vector.broadcast %58 : vector<8x1xf32> to vector<8x128xf32>
    %60 = arith.subf %57, %59 : vector<8x128xf32>
    %c0_15 = arith.constant 0 : index
    %c256_16 = arith.constant 256 : index
    %61 = vector.load %arg4[%c0_15, %c256_16] : memref<8x384xf32, #tpu.memory_space<vmem>>, vector<8x128xf32>
    tpu.vector_store %arg4[%c0_15, %c256_16], %60 {strides = array<i32>} : memref<8x384xf32, #tpu.memory_space<vmem>>, vector<8x128xf32>,
    return
  }
  func.func @transform_0(%arg0: i32) -> (i32, i32) {
    %c0_i32 = arith.constant 0 : i32
    %c0_i32_0 = arith.constant 0 : i32
    return %arg0, %c0_i32 : i32, i32
  }
  func.func @transform_1(%arg0: i32) -> (i32, i32) {
    %c0_i32 = arith.constant 0 : i32
    %c0_i32_0 = arith.constant 0 : i32
    return %arg0, %c0_i32 : i32, i32
  }
  func.func @transform_2(%arg0: i32) -> (i32, i32) {
    %c0_i32 = arith.constant 0 : i32
    %c0_i32_0 = arith.constant 0 : i32
    return %arg0, %c0_i32 : i32, i32
  }
  func.func @transform_3(%arg0: i32) -> (i32, i32) {
    %c0_i32 = arith.constant 0 : i32
    %c0_i32_0 = arith.constant 0 : i32
    return %arg0, %c0_i32 : i32, i32
  }
}

module attributes {stable_mosaic.version = 11 : i64} {
  func.func @_bp2si_heavy_kernel(%arg0: i32, %arg1: memref<8x384xf32, #tpu.memory_space<vmem>>, %arg2: memref<8x384xf32, #tpu.memory_space<vmem>>, %arg3: memref<8x384xf32, #tpu.memory_space<vmem>>, %arg4: memref<8x16xf32, #tpu.memory_space<vmem>>, %arg5: memref<8x384xf32, #tpu.memory_space<vmem>>) attributes {dimension_semantics = [#tpu.dimension_semantics<parallel>], iteration_bounds = array<i64: 1>, scalar_prefetch = 0 : i64, scratch_operands = 0 : i64, tpu.core_type = #tpu.core_type<tc>, window_params = [{transform_indices = @transform_0, window_bounds = array<i64: 8, 384>}, {transform_indices = @transform_1, window_bounds = array<i64: 8, 384>}, {transform_indices = @transform_2, window_bounds = array<i64: 8, 384>}, {transform_indices = @transform_3, window_bounds = array<i64: 8, 16>}, {transform_indices = @transform_4, window_bounds = array<i64: 8, 384>}]} {
    %c0 = arith.constant 0 : index
    %c0_0 = arith.constant 0 : index
    %0 = vector.load %arg4[%c0, %c0_0] : memref<8x16xf32, #tpu.memory_space<vmem>>, vector<8x16xf32>
    %c0_1 = arith.constant 0 : index
    %c0_2 = arith.constant 0 : index
    %1 = vector.load %arg1[%c0_1, %c0_2] : memref<8x384xf32, #tpu.memory_space<vmem>>, vector<8x128xf32>
    %c0_3 = arith.constant 0 : index
    %c128 = arith.constant 128 : index
    %2 = vector.load %arg1[%c0_3, %c128] : memref<8x384xf32, #tpu.memory_space<vmem>>, vector<8x128xf32>
    %c0_4 = arith.constant 0 : index
    %c256 = arith.constant 256 : index
    %3 = vector.load %arg1[%c0_4, %c256] : memref<8x384xf32, #tpu.memory_space<vmem>>, vector<8x128xf32>
    %c0_5 = arith.constant 0 : index
    %c0_6 = arith.constant 0 : index
    %4 = vector.load %arg2[%c0_5, %c0_6] : memref<8x384xf32, #tpu.memory_space<vmem>>, vector<8x128xf32>
    %c0_7 = arith.constant 0 : index
    %c128_8 = arith.constant 128 : index
    %5 = vector.load %arg2[%c0_7, %c128_8] : memref<8x384xf32, #tpu.memory_space<vmem>>, vector<8x128xf32>
    %c0_9 = arith.constant 0 : index
    %c256_10 = arith.constant 256 : index
    %6 = vector.load %arg2[%c0_9, %c256_10] : memref<8x384xf32, #tpu.memory_space<vmem>>, vector<8x128xf32>
    %c0_11 = arith.constant 0 : index
    %c0_12 = arith.constant 0 : index
    %7 = vector.load %arg3[%c0_11, %c0_12] : memref<8x384xf32, #tpu.memory_space<vmem>>, vector<8x128xf32>
    %c0_13 = arith.constant 0 : index
    %c128_14 = arith.constant 128 : index
    %8 = vector.load %arg3[%c0_13, %c128_14] : memref<8x384xf32, #tpu.memory_space<vmem>>, vector<8x128xf32>
    %c0_15 = arith.constant 0 : index
    %c256_16 = arith.constant 256 : index
    %9 = vector.load %arg3[%c0_15, %c256_16] : memref<8x384xf32, #tpu.memory_space<vmem>>, vector<8x128xf32>
    %10 = vector.extract_strided_slice %0 {offsets = [0, 0], sizes = [8, 1], strides = [1, 1]} : vector<8x16xf32> to vector<8x1xf32>
    %11 = vector.broadcast %10 : vector<8x1xf32> to vector<8x128xf32>
    %12 = arith.mulf %11, %1 : vector<8x128xf32>
    %13 = vector.extract_strided_slice %0 {offsets = [0, 3], sizes = [8, 1], strides = [1, 1]} : vector<8x16xf32> to vector<8x1xf32>
    %14 = vector.broadcast %13 : vector<8x1xf32> to vector<8x128xf32>
    %15 = arith.mulf %14, %2 : vector<8x128xf32>
    %16 = arith.addf %12, %15 : vector<8x128xf32>
    %17 = vector.extract_strided_slice %0 {offsets = [0, 6], sizes = [8, 1], strides = [1, 1]} : vector<8x16xf32> to vector<8x1xf32>
    %18 = vector.broadcast %17 : vector<8x1xf32> to vector<8x128xf32>
    %19 = arith.mulf %18, %3 : vector<8x128xf32>
    %20 = arith.addf %16, %19 : vector<8x128xf32>
    %21 = vector.extract_strided_slice %0 {offsets = [0, 9], sizes = [8, 1], strides = [1, 1]} : vector<8x16xf32> to vector<8x1xf32>
    %22 = vector.broadcast %21 : vector<8x1xf32> to vector<8x128xf32>
    %23 = arith.subf %20, %22 : vector<8x128xf32>
    %24 = vector.extract_strided_slice %0 {offsets = [0, 1], sizes = [8, 1], strides = [1, 1]} : vector<8x16xf32> to vector<8x1xf32>
    %25 = vector.broadcast %24 : vector<8x1xf32> to vector<8x128xf32>
    %26 = arith.mulf %25, %1 : vector<8x128xf32>
    %27 = vector.extract_strided_slice %0 {offsets = [0, 4], sizes = [8, 1], strides = [1, 1]} : vector<8x16xf32> to vector<8x1xf32>
    %28 = vector.broadcast %27 : vector<8x1xf32> to vector<8x128xf32>
    %29 = arith.mulf %28, %2 : vector<8x128xf32>
    %30 = arith.addf %26, %29 : vector<8x128xf32>
    %31 = vector.extract_strided_slice %0 {offsets = [0, 7], sizes = [8, 1], strides = [1, 1]} : vector<8x16xf32> to vector<8x1xf32>
    %32 = vector.broadcast %31 : vector<8x1xf32> to vector<8x128xf32>
    %33 = arith.mulf %32, %3 : vector<8x128xf32>
    %34 = arith.addf %30, %33 : vector<8x128xf32>
    %35 = vector.extract_strided_slice %0 {offsets = [0, 10], sizes = [8, 1], strides = [1, 1]} : vector<8x16xf32> to vector<8x1xf32>
    %36 = vector.broadcast %35 : vector<8x1xf32> to vector<8x128xf32>
    %37 = arith.subf %34, %36 : vector<8x128xf32>
    %38 = vector.extract_strided_slice %0 {offsets = [0, 2], sizes = [8, 1], strides = [1, 1]} : vector<8x16xf32> to vector<8x1xf32>
    %39 = vector.broadcast %38 : vector<8x1xf32> to vector<8x128xf32>
    %40 = arith.mulf %39, %1 : vector<8x128xf32>
    %41 = vector.extract_strided_slice %0 {offsets = [0, 5], sizes = [8, 1], strides = [1, 1]} : vector<8x16xf32> to vector<8x1xf32>
    %42 = vector.broadcast %41 : vector<8x1xf32> to vector<8x128xf32>
    %43 = arith.mulf %42, %2 : vector<8x128xf32>
    %44 = arith.addf %40, %43 : vector<8x128xf32>
    %45 = vector.extract_strided_slice %0 {offsets = [0, 8], sizes = [8, 1], strides = [1, 1]} : vector<8x16xf32> to vector<8x1xf32>
    %46 = vector.broadcast %45 : vector<8x1xf32> to vector<8x128xf32>
    %47 = arith.mulf %46, %3 : vector<8x128xf32>
    %48 = arith.addf %44, %47 : vector<8x128xf32>
    %49 = vector.extract_strided_slice %0 {offsets = [0, 11], sizes = [8, 1], strides = [1, 1]} : vector<8x16xf32> to vector<8x1xf32>
    %50 = vector.broadcast %49 : vector<8x1xf32> to vector<8x128xf32>
    %51 = arith.subf %48, %50 : vector<8x128xf32>
    %52 = arith.subf %23, %4 : vector<8x128xf32>
    %53 = arith.subf %37, %5 : vector<8x128xf32>
    %54 = arith.subf %51, %6 : vector<8x128xf32>
    %55 = arith.mulf %52, %52 : vector<8x128xf32>
    %cst = arith.constant dense<0.000000e+00> : vector<8xf32>
    %56 = vector.multi_reduction <add>, %55, %cst [1] : vector<8x128xf32> to vector<8xf32>
    %57 = vector.shape_cast %56 : vector<8xf32> to vector<8x1xf32>
    %58 = arith.mulf %53, %53 : vector<8x128xf32>
    %cst_17 = arith.constant dense<0.000000e+00> : vector<8xf32>
    %59 = vector.multi_reduction <add>, %58, %cst_17 [1] : vector<8x128xf32> to vector<8xf32>
    %60 = vector.shape_cast %59 : vector<8xf32> to vector<8x1xf32>
    %61 = arith.addf %57, %60 : vector<8x1xf32>
    %62 = arith.mulf %54, %54 : vector<8x128xf32>
    %cst_18 = arith.constant dense<0.000000e+00> : vector<8xf32>
    %63 = vector.multi_reduction <add>, %62, %cst_18 [1] : vector<8x128xf32> to vector<8xf32>
    %64 = vector.shape_cast %63 : vector<8xf32> to vector<8x1xf32>
    %65 = arith.addf %61, %64 : vector<8x1xf32>
    %cst_19 = arith.constant 9.99999968E-21 : f32
    %66 = vector.broadcast %cst_19 : f32 to vector<8x1xf32>
    %67 = arith.maximumf %65, %66 : vector<8x1xf32>
    %68 = math.rsqrt %67 : vector<8x1xf32>
    %69 = vector.broadcast %68 : vector<8x1xf32> to vector<8x128xf32>
    %70 = arith.mulf %52, %69 : vector<8x128xf32>
    %71 = vector.broadcast %68 : vector<8x1xf32> to vector<8x128xf32>
    %72 = arith.mulf %53, %71 : vector<8x128xf32>
    %73 = vector.broadcast %68 : vector<8x1xf32> to vector<8x128xf32>
    %74 = arith.mulf %54, %73 : vector<8x128xf32>
    %75 = vector.extract_strided_slice %0 {offsets = [0, 0], sizes = [8, 1], strides = [1, 1]} : vector<8x16xf32> to vector<8x1xf32>
    %76 = vector.broadcast %75 : vector<8x1xf32> to vector<8x128xf32>
    %77 = arith.mulf %76, %70 : vector<8x128xf32>
    %78 = vector.extract_strided_slice %0 {offsets = [0, 1], sizes = [8, 1], strides = [1, 1]} : vector<8x16xf32> to vector<8x1xf32>
    %79 = vector.broadcast %78 : vector<8x1xf32> to vector<8x128xf32>
    %80 = arith.mulf %79, %72 : vector<8x128xf32>
    %81 = arith.addf %77, %80 : vector<8x128xf32>
    %82 = vector.extract_strided_slice %0 {offsets = [0, 2], sizes = [8, 1], strides = [1, 1]} : vector<8x16xf32> to vector<8x1xf32>
    %83 = vector.broadcast %82 : vector<8x1xf32> to vector<8x128xf32>
    %84 = arith.mulf %83, %74 : vector<8x128xf32>
    %85 = arith.addf %81, %84 : vector<8x128xf32>
    %86 = vector.extract_strided_slice %0 {offsets = [0, 3], sizes = [8, 1], strides = [1, 1]} : vector<8x16xf32> to vector<8x1xf32>
    %87 = vector.broadcast %86 : vector<8x1xf32> to vector<8x128xf32>
    %88 = arith.mulf %87, %70 : vector<8x128xf32>
    %89 = vector.extract_strided_slice %0 {offsets = [0, 4], sizes = [8, 1], strides = [1, 1]} : vector<8x16xf32> to vector<8x1xf32>
    %90 = vector.broadcast %89 : vector<8x1xf32> to vector<8x128xf32>
    %91 = arith.mulf %90, %72 : vector<8x128xf32>
    %92 = arith.addf %88, %91 : vector<8x128xf32>
    %93 = vector.extract_strided_slice %0 {offsets = [0, 5], sizes = [8, 1], strides = [1, 1]} : vector<8x16xf32> to vector<8x1xf32>
    %94 = vector.broadcast %93 : vector<8x1xf32> to vector<8x128xf32>
    %95 = arith.mulf %94, %74 : vector<8x128xf32>
    %96 = arith.addf %92, %95 : vector<8x128xf32>
    %97 = vector.extract_strided_slice %0 {offsets = [0, 6], sizes = [8, 1], strides = [1, 1]} : vector<8x16xf32> to vector<8x1xf32>
    %98 = vector.broadcast %97 : vector<8x1xf32> to vector<8x128xf32>
    %99 = arith.mulf %98, %70 : vector<8x128xf32>
    %100 = vector.extract_strided_slice %0 {offsets = [0, 7], sizes = [8, 1], strides = [1, 1]} : vector<8x16xf32> to vector<8x1xf32>
    %101 = vector.broadcast %100 : vector<8x1xf32> to vector<8x128xf32>
    %102 = arith.mulf %101, %72 : vector<8x128xf32>
    %103 = arith.addf %99, %102 : vector<8x128xf32>
    %104 = vector.extract_strided_slice %0 {offsets = [0, 8], sizes = [8, 1], strides = [1, 1]} : vector<8x16xf32> to vector<8x1xf32>
    %105 = vector.broadcast %104 : vector<8x1xf32> to vector<8x128xf32>
    %106 = arith.mulf %105, %74 : vector<8x128xf32>
    %107 = arith.addf %103, %106 : vector<8x128xf32>
    %108 = arith.mulf %85, %85 : vector<8x128xf32>
    %cst_20 = arith.constant dense<0.000000e+00> : vector<8xf32>
    %109 = vector.multi_reduction <add>, %108, %cst_20 [1] : vector<8x128xf32> to vector<8xf32>
    %110 = vector.shape_cast %109 : vector<8xf32> to vector<8x1xf32>
    %111 = arith.mulf %96, %96 : vector<8x128xf32>
    %cst_21 = arith.constant dense<0.000000e+00> : vector<8xf32>
    %112 = vector.multi_reduction <add>, %111, %cst_21 [1] : vector<8x128xf32> to vector<8xf32>
    %113 = vector.shape_cast %112 : vector<8xf32> to vector<8x1xf32>
    %114 = arith.addf %110, %113 : vector<8x1xf32>
    %115 = arith.mulf %107, %107 : vector<8x128xf32>
    %cst_22 = arith.constant dense<0.000000e+00> : vector<8xf32>
    %116 = vector.multi_reduction <add>, %115, %cst_22 [1] : vector<8x128xf32> to vector<8xf32>
    %117 = vector.shape_cast %116 : vector<8xf32> to vector<8x1xf32>
    %118 = arith.addf %114, %117 : vector<8x1xf32>
    %cst_23 = arith.constant 9.99999968E-21 : f32
    %119 = vector.broadcast %cst_23 : f32 to vector<8x1xf32>
    %120 = arith.maximumf %118, %119 : vector<8x1xf32>
    %121 = math.rsqrt %120 : vector<8x1xf32>
    %cst_24 = arith.constant 5.000000e-01 : f32
    %122 = vector.broadcast %cst_24 : f32 to vector<8x1xf32>
    %123 = arith.mulf %121, %122 : vector<8x1xf32>
    %124 = vector.broadcast %123 : vector<8x1xf32> to vector<8x128xf32>
    %125 = arith.mulf %85, %124 : vector<8x128xf32>
    %126 = vector.broadcast %123 : vector<8x1xf32> to vector<8x128xf32>
    %127 = arith.mulf %96, %126 : vector<8x128xf32>
    %128 = arith.mulf %125, %7 : vector<8x128xf32>
    %cst_25 = arith.constant dense<0.000000e+00> : vector<8xf32>
    %129 = vector.multi_reduction <add>, %128, %cst_25 [1] : vector<8x128xf32> to vector<8xf32>
    %130 = vector.shape_cast %129 : vector<8xf32> to vector<8x1xf32>
    %131 = arith.mulf %127, %8 : vector<8x128xf32>
    %cst_26 = arith.constant dense<0.000000e+00> : vector<8xf32>
    %132 = vector.multi_reduction <add>, %131, %cst_26 [1] : vector<8x128xf32> to vector<8xf32>
    %133 = vector.shape_cast %132 : vector<8xf32> to vector<8x1xf32>
    %134 = arith.addf %130, %133 : vector<8x1xf32>
    %135 = arith.mulf %7, %7 : vector<8x128xf32>
    %cst_27 = arith.constant dense<0.000000e+00> : vector<8xf32>
    %136 = vector.multi_reduction <add>, %135, %cst_27 [1] : vector<8x128xf32> to vector<8xf32>
    %137 = vector.shape_cast %136 : vector<8xf32> to vector<8x1xf32>
    %138 = arith.mulf %8, %8 : vector<8x128xf32>
    %cst_28 = arith.constant dense<0.000000e+00> : vector<8xf32>
    %139 = vector.multi_reduction <add>, %138, %cst_28 [1] : vector<8x128xf32> to vector<8xf32>
    %140 = vector.shape_cast %139 : vector<8xf32> to vector<8x1xf32>
    %141 = arith.addf %137, %140 : vector<8x1xf32>
    %142 = arith.mulf %9, %9 : vector<8x128xf32>
    %cst_29 = arith.constant dense<0.000000e+00> : vector<8xf32>
    %143 = vector.multi_reduction <add>, %142, %cst_29 [1] : vector<8x128xf32> to vector<8xf32>
    %144 = vector.shape_cast %143 : vector<8xf32> to vector<8x1xf32>
    %145 = arith.addf %141, %144 : vector<8x1xf32>
    %cst_30 = arith.constant 9.99999968E-21 : f32
    %146 = vector.broadcast %cst_30 : f32 to vector<8x1xf32>
    %147 = arith.maximumf %145, %146 : vector<8x1xf32>
    %148 = arith.divf %134, %147 : vector<8x1xf32>
    %149 = vector.broadcast %148 : vector<8x1xf32> to vector<8x128xf32>
    %150 = arith.mulf %149, %7 : vector<8x128xf32>
    %151 = arith.subf %125, %150 : vector<8x128xf32>
    %152 = vector.broadcast %148 : vector<8x1xf32> to vector<8x128xf32>
    %153 = arith.mulf %152, %8 : vector<8x128xf32>
    %154 = arith.subf %127, %153 : vector<8x128xf32>
    %cst_31 = arith.constant 0.000000e+00 : f32
    %155 = vector.broadcast %cst_31 : f32 to vector<8x1xf32>
    %156 = arith.subf %155, %148 : vector<8x1xf32>
    %157 = vector.broadcast %156 : vector<8x1xf32> to vector<8x128xf32>
    %158 = arith.mulf %157, %9 : vector<8x128xf32>
    %159 = arith.mulf %151, %151 : vector<8x128xf32>
    %cst_32 = arith.constant dense<0.000000e+00> : vector<8xf32>
    %160 = vector.multi_reduction <add>, %159, %cst_32 [1] : vector<8x128xf32> to vector<8xf32>
    %161 = vector.shape_cast %160 : vector<8xf32> to vector<8x1xf32>
    %162 = arith.mulf %154, %154 : vector<8x128xf32>
    %cst_33 = arith.constant dense<0.000000e+00> : vector<8xf32>
    %163 = vector.multi_reduction <add>, %162, %cst_33 [1] : vector<8x128xf32> to vector<8xf32>
    %164 = vector.shape_cast %163 : vector<8xf32> to vector<8x1xf32>
    %165 = arith.addf %161, %164 : vector<8x1xf32>
    %166 = arith.mulf %158, %158 : vector<8x128xf32>
    %cst_34 = arith.constant dense<0.000000e+00> : vector<8xf32>
    %167 = vector.multi_reduction <add>, %166, %cst_34 [1] : vector<8x128xf32> to vector<8xf32>
    %168 = vector.shape_cast %167 : vector<8xf32> to vector<8x1xf32>
    %169 = arith.addf %165, %168 : vector<8x1xf32>
    %cst_35 = arith.constant 9.99999968E-21 : f32
    %170 = vector.broadcast %cst_35 : f32 to vector<8x1xf32>
    %171 = arith.maximumf %169, %170 : vector<8x1xf32>
    %172 = math.rsqrt %171 : vector<8x1xf32>
    %173 = vector.extract_strided_slice %0 {offsets = [0, 12], sizes = [8, 1], strides = [1, 1]} : vector<8x16xf32> to vector<8x1xf32>
    %174 = arith.mulf %172, %173 : vector<8x1xf32>
    %175 = vector.extract_strided_slice %0 {offsets = [0, 0], sizes = [8, 1], strides = [1, 1]} : vector<8x16xf32> to vector<8x1xf32>
    %176 = vector.broadcast %175 : vector<8x1xf32> to vector<8x128xf32>
    %177 = arith.mulf %176, %151 : vector<8x128xf32>
    %178 = vector.extract_strided_slice %0 {offsets = [0, 3], sizes = [8, 1], strides = [1, 1]} : vector<8x16xf32> to vector<8x1xf32>
    %179 = vector.broadcast %178 : vector<8x1xf32> to vector<8x128xf32>
    %180 = arith.mulf %179, %154 : vector<8x128xf32>
    %181 = arith.addf %177, %180 : vector<8x128xf32>
    %182 = vector.extract_strided_slice %0 {offsets = [0, 6], sizes = [8, 1], strides = [1, 1]} : vector<8x16xf32> to vector<8x1xf32>
    %183 = vector.broadcast %182 : vector<8x1xf32> to vector<8x128xf32>
    %184 = arith.mulf %183, %158 : vector<8x128xf32>
    %185 = arith.addf %181, %184 : vector<8x128xf32>
    %186 = vector.broadcast %174 : vector<8x1xf32> to vector<8x128xf32>
    %187 = arith.mulf %186, %185 : vector<8x128xf32>
    %188 = arith.subf %23, %187 : vector<8x128xf32>
    %c0_36 = arith.constant 0 : index
    %c0_37 = arith.constant 0 : index
    %189 = vector.load %arg5[%c0_36, %c0_37] : memref<8x384xf32, #tpu.memory_space<vmem>>, vector<8x128xf32>
    tpu.vector_store %arg5[%c0_36, %c0_37], %188 {strides = array<i32>} : memref<8x384xf32, #tpu.memory_space<vmem>>, vector<8x128xf32>,
    %190 = vector.extract_strided_slice %0 {offsets = [0, 1], sizes = [8, 1], strides = [1, 1]} : vector<8x16xf32> to vector<8x1xf32>
    %191 = vector.broadcast %190 : vector<8x1xf32> to vector<8x128xf32>
    %192 = arith.mulf %191, %151 : vector<8x128xf32>
    %193 = vector.extract_strided_slice %0 {offsets = [0, 4], sizes = [8, 1], strides = [1, 1]} : vector<8x16xf32> to vector<8x1xf32>
    %194 = vector.broadcast %193 : vector<8x1xf32> to vector<8x128xf32>
    %195 = arith.mulf %194, %154 : vector<8x128xf32>
    %196 = arith.addf %192, %195 : vector<8x128xf32>
    %197 = vector.extract_strided_slice %0 {offsets = [0, 7], sizes = [8, 1], strides = [1, 1]} : vector<8x16xf32> to vector<8x1xf32>
    %198 = vector.broadcast %197 : vector<8x1xf32> to vector<8x128xf32>
    %199 = arith.mulf %198, %158 : vector<8x128xf32>
    %200 = arith.addf %196, %199 : vector<8x128xf32>
    %201 = vector.broadcast %174 : vector<8x1xf32> to vector<8x128xf32>
    %202 = arith.mulf %201, %200 : vector<8x128xf32>
    %203 = arith.subf %37, %202 : vector<8x128xf32>
    %c0_38 = arith.constant 0 : index
    %c128_39 = arith.constant 128 : index
    %204 = vector.load %arg5[%c0_38, %c128_39] : memref<8x384xf32, #tpu.memory_space<vmem>>, vector<8x128xf32>
    tpu.vector_store %arg5[%c0_38, %c128_39], %203 {strides = array<i32>} : memref<8x384xf32, #tpu.memory_space<vmem>>, vector<8x128xf32>,
    %205 = vector.extract_strided_slice %0 {offsets = [0, 2], sizes = [8, 1], strides = [1, 1]} : vector<8x16xf32> to vector<8x1xf32>
    %206 = vector.broadcast %205 : vector<8x1xf32> to vector<8x128xf32>
    %207 = arith.mulf %206, %151 : vector<8x128xf32>
    %208 = vector.extract_strided_slice %0 {offsets = [0, 5], sizes = [8, 1], strides = [1, 1]} : vector<8x16xf32> to vector<8x1xf32>
    %209 = vector.broadcast %208 : vector<8x1xf32> to vector<8x128xf32>
    %210 = arith.mulf %209, %154 : vector<8x128xf32>
    %211 = arith.addf %207, %210 : vector<8x128xf32>
    %212 = vector.extract_strided_slice %0 {offsets = [0, 8], sizes = [8, 1], strides = [1, 1]} : vector<8x16xf32> to vector<8x1xf32>
    %213 = vector.broadcast %212 : vector<8x1xf32> to vector<8x128xf32>
    %214 = arith.mulf %213, %158 : vector<8x128xf32>
    %215 = arith.addf %211, %214 : vector<8x128xf32>
    %216 = vector.broadcast %174 : vector<8x1xf32> to vector<8x128xf32>
    %217 = arith.mulf %216, %215 : vector<8x128xf32>
    %218 = arith.subf %51, %217 : vector<8x128xf32>
    %c0_40 = arith.constant 0 : index
    %c256_41 = arith.constant 256 : index
    %219 = vector.load %arg5[%c0_40, %c256_41] : memref<8x384xf32, #tpu.memory_space<vmem>>, vector<8x128xf32>
    tpu.vector_store %arg5[%c0_40, %c256_41], %218 {strides = array<i32>} : memref<8x384xf32, #tpu.memory_space<vmem>>, vector<8x128xf32>,
    return
  }
  func.func @transform_0(%arg0: i32) -> (i32, i32) {
    %c0_i32 = arith.constant 0 : i32
    %c0_i32_0 = arith.constant 0 : i32
    return %arg0, %c0_i32 : i32, i32
  }
  func.func @transform_1(%arg0: i32) -> (i32, i32) {
    %c0_i32 = arith.constant 0 : i32
    %c0_i32_0 = arith.constant 0 : i32
    return %arg0, %c0_i32 : i32, i32
  }
  func.func @transform_2(%arg0: i32) -> (i32, i32) {
    %c0_i32 = arith.constant 0 : i32
    %c0_i32_0 = arith.constant 0 : i32
    return %arg0, %c0_i32 : i32, i32
  }
  func.func @transform_3(%arg0: i32) -> (i32, i32) {
    %c0_i32 = arith.constant 0 : i32
    %c0_i32_0 = arith.constant 0 : i32
    return %arg0, %c0_i32 : i32, i32
  }
  func.func @transform_4(%arg0: i32) -> (i32, i32) {
    %c0_i32 = arith.constant 0 : i32
    %c0_i32_0 = arith.constant 0 : i32
    return %arg0, %c0_i32 : i32, i32
  }
}

</mosaic_0001>

<bundles_post_ra>
// kernel: branch_0_fun.1
= control target key start
LH: loop header
LB: loop body
LE: loop exit
PB: predicated region body
PF: predicated region fallthrough
CT: control target
= control target key end

     0   :  { %v132_v0 = vmov 3   ;;  %v133_v1 = vmov 13   ;;  %v134_v3 = vmov 1   ;;  %v135_v4 = vmov 0   ;;  %s195_s2 = inlined_call_operand.vmem [shape: f32[8,16], index: 2, kind: input, shape index: {}]   ;;  %s196_s1 = inlined_call_operand.vmem [shape: f32[8,384], index: 1, kind: input, shape index: {}]   ;;  %s197_s0 = inlined_call_operand.vmem [shape: f32[8,384], index: 0, kind: input, shape index: {}]   ;;  %s198_s3 = inlined_call_operand.vmem [shape: f32[8,384], index: 3, kind: output, shape index: {}]  }
   0x1   :  { %120 = vset.pattern.permute.xlu1 %v132_v0  ;;  %118 = vset.pattern.permute.xlu0 %v133_v1  ;;  %v14_v2 = vld [vmem:[%s195_s2] sm:$0xff]  ;;  %v136_v5 = vmov 4   ;;  %v137_v6 = vmov 2   ;;  %v138_v7 = vmov 5   ;;  %v139_v8 = vmov 7   ;;  %v25_v17 = vld [vmem:[%s196_s1 + $0x8] sm:$0xff] }
   0x2   :  { %38 = vperm.xlu1 %120, %v14_v2   ;;  %19 = vperm.xlu0 %118, %v14_v2   ;;  %v140_v9 = vmov 6   ;;  %v141_v10 = vmov 10   ;;  %v142_v11 = vmov 8   ;;  %v143_v12 = vmov 11   ;;  %v16_v16 = vld [vmem:[%s196_s1] sm:$0xff]  ;;  %v29_v18 = vld [vmem:[%s196_s1 + $0x10] sm:$0xff] }
   0x3   :  { %v144_v13 = vmov 9   ;;  %v24_v23 = vld [vmem:[%s197_s0 + $0x8] sm:$0xff]  ;;  %v15_v24 = vld [vmem:[%s197_s0] sm:$0xff]  ;;  %v28_v26 = vld [vmem:[%s197_s0 + $0x10] sm:$0xff] }
   0x6   :  { %121 = vset.pattern.permute.xlu1 %v134_v3  ;;  %119 = vset.pattern.permute.xlu0 %v135_v4 }
   0x7   :  { %56 = vperm.xlu1 %121, %v14_v2   ;;  %33 = vperm.xlu0 %119, %v14_v2  }
   0xb   :  { %122 = vset.pattern.permute.xlu1 %v136_v5  ;;  %123 = vset.pattern.permute.xlu0 %v137_v6 }
   0xc   :  { %61 = vperm.xlu1 %122, %v14_v2   ;;  %79 = vperm.xlu0 %123, %v14_v2  }
  0x10   :  { %124 = vset.pattern.permute.xlu1 %v138_v7  ;;  %126 = vset.pattern.permute.xlu0 %v139_v8 }
  0x11   :  { %84 = vperm.xlu1 %124, %v14_v2   ;;  %67 = vperm.xlu0 %126, %v14_v2  }
  0x15   :  { %125 = vset.pattern.permute.xlu1 %v140_v9  ;;  %129 = vset.pattern.permute.xlu0 %v141_v10 }
  0x16   :  { %44 = vperm.xlu1 %125, %v14_v2   ;;  %73 = vperm.xlu0 %129, %v14_v2  }
  0x1a   :  { %127 = vset.pattern.permute.xlu1 %v142_v11  ;;  %131 = vset.pattern.permute.xlu0 %v143_v12 }
  0x1b   :  { %90 = vperm.xlu1 %127, %v14_v2  }
  0x1f   :  { %128 = vset.pattern.permute.xlu1 %v144_v13 }
  0x20   :  { %50 = vperm.xlu1 %128, %v14_v2  }
  0x24   :  { %130 = vset.pattern.permute.xlu1 %v143_v12 }
  0x25   :  { %96 = vperm.xlu1 %130, %v14_v2  }
  0x7d   :  { %v39_v14 = vpop.permute.xlu1 %38  ;;  %v20_v15 = vpop.permute.xlu0 %19 }
  0x7e   :  { %v22_v20 = vmul.f32 %v20_v15, %v16_v16  ;;  %v26_v21 = vmul.f32 %v25_v17, %v20_v15  ;;  %v30_v25 = vmul.f32 %v29_v18, %v20_v15 }
  0x80   :  { %v27_v27 = vsub.f32 %v24_v23, %v26_v21  ;;  %v23_v28 = vsub.f32 %v15_v24, %v22_v20  ;;  %v31_v32 = vsub.f32 %v28_v26, %v30_v25 }
  0x82   :  { %v57_v19 = vpop.permute.xlu1 %56  ;;  %v34_v22 = vpop.permute.xlu0 %33  ;;  %v41_v43 = vmul.f32 %v39_v14, %v27_v27 }
  0x83   :  { %v59_v33 = vmul.f32 %v57_v19, %v23_v28  ;;  %v36_v42 = vmul.f32 %v34_v22, %v23_v28 }
  0x85   :  { %v42_v46 = vadd.f32 %v41_v43, %v36_v42 }
  0x87   :  { %v62_v29 = vpop.permute.xlu1 %61  ;;  %v80_v30 = vpop.permute.xlu0 %79 }
  0x88   :  { %v64_v31 = vmul.f32 %v62_v29, %v27_v27  ;;  %v82_v47 = vmul.f32 %v80_v30, %v23_v28 }
  0x8a   :  { %v65_v36 = vadd.f32 %v64_v31, %v59_v33 }
  0x8c   :  { %v85_v34 = vpop.permute.xlu1 %84  ;;  %v68_v35 = vpop.permute.xlu0 %67 }
  0x8d   :  { %v70_v37 = vmul.f32 %v68_v35, %v31_v32  ;;  %v87_v48 = vmul.f32 %v85_v34, %v27_v27 }
  0x8f   :  { %v71_v38 = vadd.f32 %v70_v37, %v65_v36  ;;  %v88_v53 = vadd.f32 %v87_v48, %v82_v47 }
  0x91   :  { %v45_v39 = vpop.permute.xlu1 %44  ;;  %v74_v40 = vpop.permute.xlu0 %73 }
  0x92   :  { %v76_v41 = vsub.f32 %v71_v38, %v74_v40  ;;  %v47_v44 = vmul.f32 %v45_v39, %v31_v32 }
  0x94   :  { %77 = vst [vmem:[%s198_s3 + $0x8] sm:$0xff] %v76_v41  ;;  %v48_v49 = vadd.f32 %v47_v44, %v42_v46 }
  0x96   :  { %v91_v45 = vpop.permute.xlu1 %90 }
  0x97   :  { %v93_v50 = vmul.f32 %v91_v45, %v31_v32 }
  0x99   :  { %v94_v54 = vadd.f32 %v93_v50, %v88_v53 }
  0x9b   :  { %v51_v51 = vpop.permute.xlu1 %50 }
  0x9c   :  { %v53_v52 = vsub.f32 %v48_v49, %v51_v51 }
  0x9e   :  { %54 = vst [vmem:[%s198_s3] sm:$0xff] %v53_v52 }
  0xa0   :  { %v97_v55 = vpop.permute.xlu1 %96 }
  0xa1   :  { %v99_v56 = vsub.f32 %v94_v54, %v97_v55 }
  0xa3   :  { %100 = vst [vmem:[%s198_s3 + $0x10] sm:$0xff] %v99_v56 }

// kernel: branch_1_fun.1
= control target key start
LH: loop header
LB: loop body
LE: loop exit
PB: predicated region body
PF: predicated region fallthrough
CT: control target
= control target key end

     0   :  { %v253_v0 = vmov 1   ;;  %v254_v1 = vmov 0   ;;  %v255_v3 = vmov 4   ;;  %v256_v4 = vmov 3   ;;  %s402_s3 = inlined_call_operand.vmem [shape: f32[8,16], index: 3, kind: input, shape index: {}]   ;;  %s403_s0 = inlined_call_operand.vmem [shape: f32[8,384], index: 0, kind: input, shape index: {}]   ;;  %s404_s1 = inlined_call_operand.vmem [shape: f32[8,384], index: 1, kind: input, shape index: {}]   ;;  %s405_s2 = inlined_call_operand.vmem [shape: f32[8,384], index: 2, kind: input, shape index: {}]   ;;  %s406_s4 = inlined_call_operand.vmem [shape: f32[8,384], index: 4, kind: output, shape index: {}]  }
   0x1   :  { %233 = vset.pattern.permute.xlu1 %v253_v0  ;;  %231 = vset.pattern.permute.xlu0 %v254_v1  ;;  %v294_v2 = vld [vmem:[%s402_s3] sm:$0xff]  ;;  %v257_v5 = vmov 6   ;;  %v258_v6 = vmov 7   ;;  %v259_v7 = vmov 2   ;;  %v260_v8 = vmov 8   ;;  %v19_v20 = vld [vmem:[%s403_s0 + $0x8] sm:$0xff] }
   0x2   :  { %51 = vperm.xlu1 %233, %v294_v2   ;;  %29 = vperm.xlu0 %231, %v294_v2   ;;  %v261_v9 = vmov 5   ;;  %v262_v10 = vmov 11   ;;  %v263_v11 = vmov 9   ;;  %v264_v12 = vmov 10   ;;  %v18_v19 = vld [vmem:[%s403_s0] sm:$0xff]  ;;  %v20_v24 = vld [vmem:[%s403_s0 + $0x10] sm:$0xff] }
   0x3   :  { %v21_v39 = vld [vmem:[%s404_s1] sm:$0xff]  ;;  %v23_v42 = vld [vmem:[%s404_s1 + $0x10] sm:$0xff]  ;;  %v22_v49 = vld [vmem:[%s404_s1 + $0x8] sm:$0xff] }
   0x6   :  { %234 = vset.pattern.permute.xlu1 %v255_v3  ;;  %232 = vset.pattern.permute.xlu0 %v256_v4 }
   0x7   :  { %56 = vperm.xlu1 %234, %v294_v2   ;;  %34 = vperm.xlu0 %232, %v294_v2  }
   0xb   :  { %235 = vset.pattern.permute.xlu1 %v257_v5  ;;  %236 = vset.pattern.permute.xlu0 %v258_v6 }
   0xc   :  { %40 = vperm.xlu1 %235, %v294_v2   ;;  %62 = vperm.xlu0 %236, %v294_v2  }
  0x10   :  { %237 = vset.pattern.permute.xlu1 %v259_v7  ;;  %239 = vset.pattern.permute.xlu0 %v260_v8 }
  0x11   :  { %73 = vperm.xlu1 %237, %v294_v2   ;;  %84 = vperm.xlu0 %239, %v294_v2  }
  0x15   :  { %238 = vset.pattern.permute.xlu1 %v261_v9  ;;  %242 = vset.pattern.permute.xlu0 %v262_v10 }
  0x16   :  { %78 = vperm.xlu1 %238, %v294_v2   ;;  %90 = vperm.xlu0 %242, %v294_v2  }
  0x1a   :  { %240 = vset.pattern.permute.xlu1 %v263_v11 }
  0x1b   :  { %46 = vperm.xlu1 %240, %v294_v2  }
  0x1f   :  { %241 = vset.pattern.permute.xlu1 %v264_v12 }
  0x20   :  { %68 = vperm.xlu1 %241, %v294_v2  }
  0x7d   :  { %v308_v13 = vpop.permute.xlu1 %51  ;;  %v310_v14 = vpop.permute.xlu0 %29 }
  0x7e   :  { %v32_v22 = vmul.f32 %v310_v14, %v18_v19  ;;  %v54_v36 = vmul.f32 %v308_v13, %v18_v19 }
  0x82   :  { %v312_v15 = vpop.permute.xlu1 %56  ;;  %v314_v16 = vpop.permute.xlu0 %34 }
  0x83   :  { %v37_v23 = vmul.f32 %v314_v16, %v19_v20  ;;  %v59_v32 = vmul.f32 %v312_v15, %v19_v20 }
  0x85   :  { %v38_v28 = vadd.f32 %v37_v23, %v32_v22  ;;  %v60_v44 = vadd.f32 %v59_v32, %v54_v36 }
  0x87   :  { %v316_v17 = vpop.permute.xlu1 %40  ;;  %v318_v18 = vpop.permute.xlu0 %62 }
  0x88   :  { %v43_v26 = vmul.f32 %v316_v17, %v20_v24  ;;  %v65_v37 = vmul.f32 %v318_v18, %v20_v24 }
  0x8a   :  { %v44_v34 = vadd.f32 %v43_v26, %v38_v28  ;;  %v66_v46 = vadd.f32 %v65_v37, %v60_v44 }
  0x8c   :  { %v326_v21 = vpop.permute.xlu1 %73  ;;  %v333_v25 = vpop.permute.xlu0 %84 }
  0x8d   :  { %v76_v29 = vmul.f32 %v326_v21, %v18_v19  ;;  %v87_v31 = vmul.f32 %v333_v25, %v20_v24 }
  0x91   :  { %v336_v27 = vpop.permute.xlu1 %78  ;;  %v91_v35 = vpop.permute.xlu0 %90 }
  0x92   :  { %v81_v30 = vmul.f32 %v336_v27, %v19_v20 }
  0x94   :  { %v82_v33 = vadd.f32 %v81_v30, %v76_v29  ;;  %v24_v29 = vld [vmem:[%s405_s2] sm:$0xff] }
  0x95   :  { %v151_v30 = vmul.f32 %v24_v29, %v24_v29 }
  0x96   :  { %v47_v38 = vpop.permute.xlu1 %46  ;;  %v88_v40 = vadd.f32 %v87_v31, %v82_v33  ;;  %v25_v31 = vld [vmem:[%s405_s2 + $0x8] sm:$0xff]  ;;  %v26_v33 = vld [vmem:[%s405_s2 + $0x10] sm:$0xff] }
  0x97   :  { %v347_v41 = vsub.f32 %v44_v34, %v47_v38  ;;  %v154_v32 = vmul.f32 %v25_v31, %v25_v31  ;;  %v158_v34 = vmul.f32 %v26_v33, %v26_v33 }
  0x98   :  { %v352_v43 = vsub.f32 %v88_v40, %v91_v35 }
  0x99   :  { %v94_v45 = vsub.f32 %v347_v41, %v21_v39 }
  0x9a   :  { %v96_v47 = vsub.f32 %v352_v43, %v23_v42 }
  0x9b   :  { %v69_v48 = vpop.permute.xlu1 %68  ;;  %v97_v50 = vmul.f32 %v94_v45, %v94_v45 }
  0x9c   :  { %v359_v51 = vsub.f32 %v66_v46, %v69_v48  ;;  %v104_v53 = vmul.f32 %v96_v47, %v96_v47 }
  0x9d   :  { %98 = vadd.xlane.f32.xlu1 %v97_v50 }
  0x9e   :  { %v95_v52 = vsub.f32 %v359_v51, %v22_v49 }
  0xa0   :  { %v100_v54 = vmul.f32 %v95_v52, %v95_v52 }
  0xa1   :  { %105 = vadd.xlane.f32.xlu1 %v104_v53 }
  0xa2   :  { %101 = vadd.xlane.f32.xlu0 %v100_v54 }
 0x126   :  { %v99_v55 = vpop.xlane.xlu1 %98 }
 0x12a   :  { %v106_v58 = vpop.xlane.xlu1 %105 }
 0x12b   :  { %v102_v56 = vpop.xlane.xlu0 %101 }
 0x12c   :  { %v103_v57 = vadd.f32 %v102_v56, %v99_v55 }
 0x12e   :  { %v107_v59 = vadd.f32 %v106_v58, %v103_v57 }
 0x130   :  { %v108_v60 = vmax.f32 %v107_v59, 1e-20 }
 0x132   :  { %245 = vrsqrt.f32 %v108_v60 }
 0x13f   :  { %v246_v61 = vpop.eup %245 }
 0x140   :  { %v110_v62 = vmul.f32 %v246_v61, %v94_v45  ;;  %v111_v63 = vmul.f32 %v246_v61, %v95_v52  ;;  %v112_v0 = vmul.f32 %v246_v61, %v96_v47 }
 0x142   :  { %v118_v1 = vmul.f32 %v110_v62, %v314_v16  ;;  %v119_v3 = vmul.f32 %v111_v63, %v312_v15  ;;  %v113_v4 = vmul.f32 %v110_v62, %v310_v14  ;;  %v114_v5 = vmul.f32 %v111_v63, %v308_v13 }
 0x143   :  { %v123_v6 = vmul.f32 %v110_v62, %v316_v17  ;;  %v124_v7 = vmul.f32 %v111_v63, %v318_v18  ;;  %v121_v9 = vmul.f32 %v112_v0, %v336_v27  ;;  %v116_v11 = vmul.f32 %v112_v0, %v326_v21 }
 0x144   :  { %v120_v8 = vadd.f32 %v119_v3, %v118_v1  ;;  %v115_v10 = vadd.f32 %v114_v5, %v113_v4  ;;  %v126_v22 = vmul.f32 %v112_v0, %v333_v25 }
 0x145   :  { %v125_v12 = vadd.f32 %v124_v7, %v123_v6 }
 0x146   :  { %v122_v19 = vadd.f32 %v121_v9, %v120_v8  ;;  %v117_v20 = vadd.f32 %v116_v11, %v115_v10 }
 0x147   :  { %v127_v26 = vadd.f32 %v126_v22, %v125_v12 }
 0x148   :  { %v131_v23 = vmul.f32 %v122_v19, %v122_v19  ;;  %v128_v24 = vmul.f32 %v117_v20, %v117_v20 }
 0x149   :  { %v135_v28 = vmul.f32 %v127_v26, %v127_v26  ;;  %v265_v26 = vmov 12  }
 0x14a   :  { %132 = vadd.xlane.f32.xlu1 %v131_v23  ;;  %129 = vadd.xlane.f32.xlu0 %v128_v24 }
 0x14b   :  { %243 = vset.pattern.permute.xlu1 %v265_v26  ;;  %244 = vset.pattern.permute.xlu0 %v265_v26 }
 0x14e   :  { %136 = vadd.xlane.f32.xlu0 %v135_v28  ;;  %152 = vadd.xlane.f32.xlu1 %v151_v30 }
 0x152   :  { %155 = vadd.xlane.f32.xlu0 %v154_v32  ;;  %159 = vadd.xlane.f32.xlu1 %v158_v34 }
 0x1d3   :  { %v133_v35 = vpop.xlane.xlu1 %132  ;;  %v130_v36 = vpop.xlane.xlu0 %129 }
 0x1d4   :  { %v134_v37 = vadd.f32 %v133_v35, %v130_v36 }
 0x1d7   :  { %v137_v38 = vpop.xlane.xlu0 %136  ;;  %v153_v49 = vpop.xlane.xlu1 %152 }
 0x1d8   :  { %v138_v39 = vadd.f32 %v137_v38, %v134_v37 }
 0x1da   :  { %v139_v40 = vmax.f32 %v138_v39, 1e-20 }
 0x1db   :  { %v156_v50 = vpop.xlane.xlu0 %155  ;;  %v160_v53 = vpop.xlane.xlu1 %159 }
 0x1dc   :  { %247 = vrsqrt.f32 %v139_v40  ;;  %v157_v52 = vadd.f32 %v156_v50, %v153_v49 }
 0x1de   :  { %v161_v54 = vadd.f32 %v160_v53, %v157_v52 }
 0x1e0   :  { %v162_v55 = vmax.f32 %v161_v54, 1e-20 }
 0x1e2   :  { %249 = vrcp.f32 %v162_v55 }
 0x1e9   :  { %v248_v42 = vpop.eup %247 }
 0x1ea   :  { %v141_v44 = vmul.f32 0.5, %v248_v42 }
 0x1ec   :  { %v143_v45 = vmul.f32 %v141_v44, %v122_v19  ;;  %v142_v46 = vmul.f32 %v141_v44, %v117_v20 }
 0x1ee   :  { %v147_v47 = vmul.f32 %v143_v45, %v25_v31  ;;  %v144_v48 = vmul.f32 %v142_v46, %v24_v29 }
 0x1ef   :  { %v250_v59 = vpop.eup %249 }
 0x1f0   :  { %148 = vadd.xlane.f32.xlu1 %v147_v47  ;;  %145 = vadd.xlane.f32.xlu0 %v144_v48 }
 0x279   :  { %v149_v56 = vpop.xlane.xlu1 %148  ;;  %v146_v57 = vpop.xlane.xlu0 %145 }
 0x27a   :  { %v150_v58 = vadd.f32 %v149_v56, %v146_v57 }
 0x27c   :  { %v164_v60 = vmul.f32 %v250_v59, %v150_v58 }
 0x27e   :  { %v165_v61 = vmul.f32 %v164_v60, %v24_v29  ;;  %v167_v62 = vmul.f32 %v164_v60, %v25_v31  ;;  %v169_v63 = vsub.f32 0.0, %v164_v60 }
 0x280   :  { %v166_v0 = vsub.f32 %v142_v46, %v165_v61  ;;  %v168_v1 = vsub.f32 %v143_v45, %v167_v62  ;;  %v170_v3 = vmul.f32 %v169_v63, %v26_v33 }
 0x282   :  { %v174_v4 = vmul.f32 %v168_v1, %v168_v1  ;;  %v171_v5 = vmul.f32 %v166_v0, %v166_v0  ;;  %v185_v6 = vmul.f32 %v166_v0, %v310_v14  ;;  %v186_v7 = vmul.f32 %v168_v1, %v314_v16 }
 0x283   :  { %v198_v8 = vmul.f32 %v166_v0, %v308_v13  ;;  %v199_v9 = vmul.f32 %v168_v1, %v312_v15  ;;  %v206_v10 = vmul.f32 %v166_v0, %v326_v21  ;;  %v207_v11 = vmul.f32 %v168_v1, %v336_v27 }
 0x284   :  { %175 = vadd.xlane.f32.xlu1 %v174_v4  ;;  %172 = vadd.xlane.f32.xlu0 %v171_v5  ;;  %v187_v12 = vadd.f32 %v186_v7, %v185_v6  ;;  %v188_v19 = vmul.f32 %v170_v3, %v316_v17  ;;  %v201_v22 = vmul.f32 %v170_v3, %v318_v18 }
 0x285   :  { %v200_v20 = vadd.f32 %v199_v9, %v198_v8  ;;  %v178_v23 = vmul.f32 %v170_v3, %v170_v3  ;;  %v208_v14 = vadd.f32 %v207_v11, %v206_v10  ;;  %v209_v16 = vmul.f32 %v170_v3, %v333_v25 }
 0x286   :  { %v189_v24 = vadd.f32 %v188_v19, %v187_v12 }
 0x287   :  { %v202_v13 = vadd.f32 %v201_v22, %v200_v20  ;;  %v210_v15 = vadd.f32 %v209_v16, %v208_v14 }
 0x288   :  { %179 = vadd.xlane.f32.xlu0 %v178_v23 }
 0x30d   :  { %v176_v21 = vpop.xlane.xlu1 %175  ;;  %v173_v28 = vpop.xlane.xlu0 %172 }
 0x30e   :  { %v177_v27 = vadd.f32 %v176_v21, %v173_v28 }
 0x311   :  { %v180_v29 = vpop.xlane.xlu0 %179 }
 0x312   :  { %v181_v30 = vadd.f32 %v180_v29, %v177_v27 }
 0x314   :  { %v182_v17 = vmax.f32 %v181_v30, 1e-20 }
 0x316   :  { %251 = vrsqrt.f32 %v182_v17 }
 0x323   :  { %v252_v31 = vpop.eup %251 }
 0x324   :  { %v184_v18 = vmul.f32 %v252_v31, %v294_v2 }
 0x326   :  { %192 = vperm.xlu1 %243, %v184_v18  }
 0x3a1   :  { %v193_v32 = vpop.permute.xlu1 %192 }
 0x3a2   :  { %v195_v25 = vmul.f32 %v193_v32, %v189_v24  ;;  %v203_v33 = vmul.f32 %v202_v13, %v193_v32  ;;  %v211_v34 = vmul.f32 %v210_v15, %v193_v32 }
 0x3a4   :  { %v196_v35 = vsub.f32 %v347_v41, %v195_v25  ;;  %v204_v36 = vsub.f32 %v359_v51, %v203_v33  ;;  %v212_v37 = vsub.f32 %v352_v43, %v211_v34 }
 0x3a6   :  { %197 = vst [vmem:[%s406_s4] sm:$0xff] %v196_v35  ;;  %205 = vst [vmem:[%s406_s4 + $0x8] sm:$0xff] %v204_v36 }
 0x3a7   :  { %213 = vst [vmem:[%s406_s4 + $0x10] sm:$0xff] %v212_v37 }

</bundles_post_ra>
